<compile_context>
chip_gen: v6e
topology: v6e:2x2x1
jax: 0.10.0
libtpu: 0.0.40
codegen_flags: <defaults>
</compile_context>

<pallas_src>
import functools

import jax
import jax.numpy as jnp
from jax import lax
from jax.experimental import pallas as pl
from jax.experimental.pallas import tpu as pltpu

_LANE = 128
_SUB = 8
_BLOCK_ROWS = 4096  # (4096,128) f32 tile = 2 MiB; 2 inputs x 2 bufs = 8 MiB VMEM


def _softdice_partial_kernel(o_ref, t_ref, inter_out_ref, sum_out_ref,
                             inter_acc, sum_acc, *,
                             block_rows, valid_rows, steps_per_core,
                             mask_from_step, total_steps):
    p = pl.program_id(0)
    j = pl.program_id(1)

    @pl.when(j == 0)
    def _init():
        inter_acc[...] = jnp.zeros_like(inter_acc)
        sum_acc[...] = jnp.zeros_like(sum_acc)

    o = o_ref[...].astype(jnp.float32)
    t = t_ref[...].astype(jnp.float32)

    groups = block_rows // _SUB

    def accumulate(ov, tv):
        # Fold the tile's sublane groups into (8,128) per-lane accumulators:
        # pure VPU add tree (no XLU), keeps VMEM ld/st ~= input loads only.
        inter_acc[...] += jnp.sum((ov * tv).reshape(groups, _SUB, _LANE), axis=0)
        sum_acc[...] += jnp.sum((ov + tv).reshape(groups, _SUB, _LANE), axis=0)

    # Logical tile index over the flattened (rows, 128) slab.
    step = p * steps_per_core + j

    if mask_from_step < total_steps:  # static: some tile needs row masking
        @pl.when(step < mask_from_step)
        def _hot():
            accumulate(o, t)

        @pl.when(step >= mask_from_step)
        def _tail():
            # Zero rows past the real data (partial last tile / clamped
            # out-of-range tiles). jnp.where so stale-VMEM NaN/Inf cannot leak.
            rows_left = valid_rows - step * block_rows
            row_ids = lax.broadcasted_iota(jnp.int32, (block_rows, _LANE), 0)
            m = row_ids < rows_left
            accumulate(jnp.where(m, o, 0.0), jnp.where(m, t, 0.0))
    else:
        accumulate(o, t)

    @pl.when(j == pl.num_programs(1) - 1)
    def _finalize():
        inter_out_ref[0] = inter_acc[...]
        sum_out_ref[0] = sum_acc[...]


def soft_dice(output, target, eps=1e-7, block_rows=_BLOCK_ROWS):
    assert output.shape == target.shape
    n = int(output.size)

    # Stream inputs in their native dtype (kernel widens to f32); the kernel is
    # purely HBM-bandwidth bound so no wrapper-side astype / materialized copy.
    o = output.reshape(-1)
    t = target.reshape(-1)

    align = _SUB * _LANE  # 1024 elems = one f32 (8,128) register tile
    n_pad = pl.cdiv(n, align) * align
    if n_pad != n:
        # Only hit when N % 1024 != 0; zero padding is sum-neutral (background
        # terms are derived analytically from the true N below).
        o = jnp.pad(o, (0, n_pad - n))
        t = jnp.pad(t, (0, n_pad - n))
    rows = n_pad // _LANE            # multiple of 8
    o = o.reshape(rows, _LANE)       # free reshape, no copy
    t = t.reshape(rows, _LANE)

    br = min(block_rows, rows)       # multiple of 8 either way
    nblocks = pl.cdiv(rows, br)

    # v7x has 2 TensorCores: a leading "parallel" axis lets Mosaic split the
    # streaming reduction across them (per-core partials combined in JAX).
    # On 1-TC chips (v5e/v6e) the axis just iterates sequentially (negligible).
    n_cores = 2 if nblocks >= 2 else 1
    spc = pl.cdiv(nblocks, n_cores)  # steps per core
    total_steps = n_cores * spc

    if total_steps == nblocks:
        in_idx = lambda p, j: (p * spc + j, 0)
    else:
        # Odd tile count: clamp the trailing (p, j) tile onto the last valid
        # tile (keeps the DMA in bounds); its contribution is masked in-kernel.
        in_idx = lambda p, j: (jnp.minimum(p * spc + j, nblocks - 1), 0)

    partial_last = (rows % br) != 0
    mask_from_step = (nblocks - 1) if partial_last else nblocks

    kernel = functools.partial(
        _softdice_partial_kernel,
        block_rows=br, valid_rows=rows, steps_per_core=spc,
        mask_from_step=mask_from_step, total_steps=total_steps)

    bytes_accessed = n * (output.dtype.itemsize + target.dtype.itemsize)
    cost = pl.CostEstimate(flops=4 * n, transcendentals=0,
                           bytes_accessed=int(bytes_accessed))

    inter_part, sum_part = pl.pallas_call(
        kernel,
        out_shape=(
            jax.ShapeDtypeStruct((n_cores, _SUB, _LANE), jnp.float32),
            jax.ShapeDtypeStruct((n_cores, _SUB, _LANE), jnp.float32),
        ),
        grid_spec=pltpu.PrefetchScalarGridSpec(
            num_scalar_prefetch=0,
            grid=(n_cores, spc),
            in_specs=[
                pl.BlockSpec((br, _LANE), in_idx),
                pl.BlockSpec((br, _LANE), in_idx),
            ],
            out_specs=[
                pl.BlockSpec((1, _SUB, _LANE), lambda p, j: (p, 0, 0)),
                pl.BlockSpec((1, _SUB, _LANE), lambda p, j: (p, 0, 0)),
            ],
            scratch_shapes=[
                pltpu.VMEM((_SUB, _LANE), jnp.float32),
                pltpu.VMEM((_SUB, _LANE), jnp.float32),
            ],
        ),
        compiler_params=pltpu.CompilerParams(
            dimension_semantics=("parallel", "arbitrary"),
            vmem_limit_bytes=32 << 20),
        cost_estimate=cost,
    )(o, t)

    # Finalize (tiny scalar math) in plain JAX on the per-core partials.
    inter = jnp.sum(inter_part)                # sum(o * t)
    s = jnp.sum(sum_part)                      # sum(o) + sum(t)
    n_f = jnp.float32(n)
    dice = (2.0 * inter + eps) / (s + eps)
    inter_b = n_f - s + inter                  # sum((1-o)*(1-t))
    dice_b = (2.0 * inter_b + eps) / (2.0 * n_f - s + eps)
    return 1.0 - (dice + dice_b) * 0.5


def _soft_dice_ref(output, target, eps=1e-7):
    o = output.astype(jnp.float32)
    t = target.astype(jnp.float32)

    def dice(a, b):
        return (2.0 * jnp.sum(a * b) + eps) / (jnp.sum(a) + jnp.sum(b) + eps)

    return 1.0 - (dice(o, t) + dice(1.0 - o, 1.0 - t)) * 0.5


if __name__ == "__main__":
    key = jax.random.PRNGKey(0)
    k1, k2 = jax.random.split(key)
    B, C, H, W = 2, 4, 16, 16
    # "output" are predicted probabilities, "target" is a binary mask (NCHW).
    output = jax.nn.sigmoid(jax.random.normal(k1, (B, C, H, W), jnp.float32))
    target = (jax.random.uniform(k2, (B, C, H, W)) > 0.5).astype(jnp.float32)

    loss_fn = jax.jit(soft_dice)
    loss = jax.block_until_ready(loss_fn(output, target))
    ref = jax.block_until_ready(_soft_dice_ref(output, target))
    assert jnp.allclose(loss, ref, rtol=1e-5, atol=1e-6), (loss, ref)
    print("KERNEL_OK")
</pallas_src>

<mosaic_0001>
module attributes {stable_mosaic.version = 11 : i64} {
  func.func @_softdice_partial_kernel(%arg0: i32, %arg1: i32, %arg2: memref<16x128xf32, #tpu.memory_space<vmem>>, %arg3: memref<16x128xf32, #tpu.memory_space<vmem>>, %arg4: memref<1x8x128xf32, #tpu.memory_space<vmem>>, %arg5: memref<1x8x128xf32, #tpu.memory_space<vmem>>, %arg6: memref<8x128xf32, #tpu.memory_space<vmem>>, %arg7: memref<8x128xf32, #tpu.memory_space<vmem>>) attributes {dimension_semantics = [#tpu.dimension_semantics<parallel>, #tpu.dimension_semantics<arbitrary>], iteration_bounds = array<i64: 1, 1>, scalar_prefetch = 0 : i64, scratch_operands = 2 : i64, tpu.core_type = #tpu.core_type<tc>, window_params = [{transform_indices = @transform_0, window_bounds = array<i64: 16, 128>}, {transform_indices = @transform_1, window_bounds = array<i64: 16, 128>}, {transform_indices = @transform_2, window_bounds = array<i64: 1, 8, 128>}, {transform_indices = @transform_3, window_bounds = array<i64: 1, 8, 128>}]} {
    %c0_i32 = arith.constant 0 : i32
    %0 = arith.cmpi eq, %arg1, %c0_i32 : i32
    %1 = arith.extui %0 : i1 to i32
    %c0_i32_0 = arith.constant 0 : i32
    %2 = arith.cmpi ne, %1, %c0_i32_0 : i32
    scf.if %2 {
      %cst_15 = arith.constant 0.000000e+00 : f32
      %20 = vector.broadcast %cst_15 : f32 to vector<8x128xf32>
      %c0_16 = arith.constant 0 : index
      %c0_17 = arith.constant 0 : index
      %21 = vector.load %arg6[%c0_16, %c0_17] : memref<8x128xf32, #tpu.memory_space<vmem>>, vector<8x128xf32>
      tpu.vector_store %arg6[%c0_16, %c0_17], %20 {strides = array<i32>} : memref<8x128xf32, #tpu.memory_space<vmem>>, vector<8x128xf32>,
      %cst_18 = arith.constant 0.000000e+00 : f32
      %22 = vector.broadcast %cst_18 : f32 to vector<8x128xf32>
      %c0_19 = arith.constant 0 : index
      %c0_20 = arith.constant 0 : index
      %23 = vector.load %arg7[%c0_19, %c0_20] : memref<8x128xf32, #tpu.memory_space<vmem>>, vector<8x128xf32>
      tpu.vector_store %arg7[%c0_19, %c0_20], %22 {strides = array<i32>} : memref<8x128xf32, #tpu.memory_space<vmem>>, vector<8x128xf32>,
    } else {
    }
    %c0 = arith.constant 0 : index
    %c0_1 = arith.constant 0 : index
    %3 = vector.load %arg2[%c0, %c0_1] : memref<16x128xf32, #tpu.memory_space<vmem>>, vector<16x128xf32>
    %c0_2 = arith.constant 0 : index
    %c0_3 = arith.constant 0 : index
    %4 = vector.load %arg3[%c0_2, %c0_3] : memref<16x128xf32, #tpu.memory_space<vmem>>, vector<16x128xf32>
    %c0_4 = arith.constant 0 : index
    %c0_5 = arith.constant 0 : index
    %5 = vector.load %arg6[%c0_4, %c0_5] : memref<8x128xf32, #tpu.memory_space<vmem>>, vector<8x128xf32>
    %6 = arith.mulf %3, %4 : vector<16x128xf32>
    %7 = vector.shape_cast %6 : vector<16x128xf32> to vector<2x8x128xf32>
    %cst = arith.constant dense<0.000000e+00> : vector<8x128xf32>
    %8 = vector.multi_reduction <add>, %7, %cst [0] : vector<2x8x128xf32> to vector<8x128xf32>
    %9 = arith.addf %5, %8 : vector<8x128xf32>
    %c0_6 = arith.constant 0 : index
    %c0_7 = arith.constant 0 : index
    %10 = vector.load %arg6[%c0_6, %c0_7] : memref<8x128xf32, #tpu.memory_space<vmem>>, vector<8x128xf32>
    tpu.vector_store %arg6[%c0_6, %c0_7], %9 {strides = array<i32>} : memref<8x128xf32, #tpu.memory_space<vmem>>, vector<8x128xf32>,
    %c0_8 = arith.constant 0 : index
    %c0_9 = arith.constant 0 : index
    %11 = vector.load %arg7[%c0_8, %c0_9] : memref<8x128xf32, #tpu.memory_space<vmem>>, vector<8x128xf32>
    %12 = arith.addf %3, %4 : vector<16x128xf32>
    %13 = vector.shape_cast %12 : vector<16x128xf32> to vector<2x8x128xf32>
    %cst_10 = arith.constant dense<0.000000e+00> : vector<8x128xf32>
    %14 = vector.multi_reduction <add>, %13, %cst_10 [0] : vector<2x8x128xf32> to vector<8x128xf32>
    %15 = arith.addf %11, %14 : vector<8x128xf32>
    %c0_11 = arith.constant 0 : index
    %c0_12 = arith.constant 0 : index
    %16 = vector.load %arg7[%c0_11, %c0_12] : memref<8x128xf32, #tpu.memory_space<vmem>>, vector<8x128xf32>
    tpu.vector_store %arg7[%c0_11, %c0_12], %15 {strides = array<i32>} : memref<8x128xf32, #tpu.memory_space<vmem>>, vector<8x128xf32>,
    %c0_i32_13 = arith.constant 0 : i32
    %17 = arith.cmpi eq, %arg1, %c0_i32_13 : i32
    %18 = arith.extui %17 : i1 to i32
    %c0_i32_14 = arith.constant 0 : i32
    %19 = arith.cmpi ne, %18, %c0_i32_14 : i32
    scf.if %19 {
      %c0_15 = arith.constant 0 : index
      %c0_16 = arith.constant 0 : index
      %20 = vector.load %arg6[%c0_15, %c0_16] : memref<8x128xf32, #tpu.memory_space<vmem>>, vector<8x128xf32>
      %c0_17 = arith.constant 0 : index
      %c0_18 = arith.constant 0 : index
      %c0_19 = arith.constant 0 : index
      %21 = vector.load %arg4[%c0_17, %c0_18, %c0_19] : memref<1x8x128xf32, #tpu.memory_space<vmem>>, vector<1x8x128xf32>
      %22 = vector.shape_cast %21 : vector<1x8x128xf32> to vector<8x128xf32>
      %23 = vector.shape_cast %20 : vector<8x128xf32> to vector<1x8x128xf32>
      tpu.vector_store %arg4[%c0_17, %c0_18, %c0_19], %23 {strides = array<i32>} : memref<1x8x128xf32, #tpu.memory_space<vmem>>, vector<1x8x128xf32>,
      %c0_20 = arith.constant 0 : index
      %c0_21 = arith.constant 0 : index
      %24 = vector.load %arg7[%c0_20, %c0_21] : memref<8x128xf32, #tpu.memory_space<vmem>>, vector<8x128xf32>
      %c0_22 = arith.constant 0 : index
      %c0_23 = arith.constant 0 : index
      %c0_24 = arith.constant 0 : index
      %25 = vector.load %arg5[%c0_22, %c0_23, %c0_24] : memref<1x8x128xf32, #tpu.memory_space<vmem>>, vector<1x8x128xf32>
      %26 = vector.shape_cast %25 : vector<1x8x128xf32> to vector<8x128xf32>
      %27 = vector.shape_cast %24 : vector<8x128xf32> to vector<1x8x128xf32>
      tpu.vector_store %arg5[%c0_22, %c0_23, %c0_24], %27 {strides = array<i32>} : memref<1x8x128xf32, #tpu.memory_space<vmem>>, vector<1x8x128xf32>,
    } else {
    }
    return
  }
  func.func @transform_0(%arg0: i32, %arg1: i32) -> (i32, i32) {
    %c1_i32 = arith.constant 1 : i32
    %0 = arith.muli %arg0, %c1_i32 : i32
    %1 = arith.addi %0, %arg1 : i32
    %c0_i32 = arith.constant 0 : i32
    %c0_i32_0 = arith.constant 0 : i32
    return %1, %c0_i32 : i32, i32
  }
  func.func @transform_1(%arg0: i32, %arg1: i32) -> (i32, i32) {
    %c1_i32 = arith.constant 1 : i32
    %0 = arith.muli %arg0, %c1_i32 : i32
    %1 = arith.addi %0, %arg1 : i32
    %c0_i32 = arith.constant 0 : i32
    %c0_i32_0 = arith.constant 0 : i32
    return %1, %c0_i32 : i32, i32
  }
  func.func @transform_2(%arg0: i32, %arg1: i32) -> (i32, i32, i32) {
    %c0_i32 = arith.constant 0 : i32
    %c0_i32_0 = arith.constant 0 : i32
    %c0_i32_1 = arith.constant 0 : i32
    return %arg0, %c0_i32, %c0_i32_0 : i32, i32, i32
  }
  func.func @transform_3(%arg0: i32, %arg1: i32) -> (i32, i32, i32) {
    %c0_i32 = arith.constant 0 : i32
    %c0_i32_0 = arith.constant 0 : i32
    %c0_i32_1 = arith.constant 0 : i32
    return %arg0, %c0_i32, %c0_i32_0 : i32, i32, i32
  }
}

</mosaic_0001>

<bundles_post_ra>
// kernel: soft_dice.1
= control target key start
LH: loop header
LB: loop body
LE: loop exit
PB: predicated region body
PF: predicated region fallthrough
CT: control target
= control target key end

     0   :  { %s144_s0 = inlined_call_operand.vmem [shape: f32[16,128], index: 0, kind: input, shape index: {}]   ;;  %s145_s1 = inlined_call_operand.vmem [shape: f32[16,128], index: 1, kind: input, shape index: {}]   ;;  %s146_s2 = inlined_call_operand.vmem [shape: f32[1,8,128], index: 2, kind: output, shape index: {0}]   ;;  %s147_s3 = inlined_call_operand.vmem [shape: f32[1,8,128], index: 3, kind: output, shape index: {1}]  }
   0x1   :  { %v63_v0 = vld [vmem:[%s144_s0] sm:$0xff]  ;;  %v64_v1 = vld [vmem:[%s144_s0 + $0x8] sm:$0xff] }
   0x2   :  { %v65_v2 = vld [vmem:[%s145_s1] sm:$0xff]  ;;  %v66_v3 = vld [vmem:[%s145_s1 + $0x8] sm:$0xff] }
   0x3   :  { %v68_v4 = vmul.f32 %v65_v2, %v63_v0  ;;  %v74_v5 = vadd.f32 %v65_v2, %v63_v0  ;;  %v69_v6 = vmul.f32 %v66_v3, %v64_v1  ;;  %v75_v7 = vadd.f32 %v66_v3, %v64_v1 }
   0x5   :  { %v70_v8 = vadd.f32 %v69_v6, %v68_v4  ;;  %v76_v9 = vadd.f32 %v75_v7, %v74_v5 }
   0x7   :  { %83 = vst [vmem:[%s146_s2] sm:$0xff] %v70_v8  ;;  %85 = vst [vmem:[%s147_s3] sm:$0xff] %v76_v9 }

</bundles_post_ra>
